<compile_context>
chip_gen: v7x
topology: tpu7x:2x2x1
jax: 0.10.0
libtpu: 0.0.40
codegen_flags: <defaults>
</compile_context>

<pallas_src>
import numpy as np
import jax
import jax.numpy as jnp
from jax.experimental import pallas as pl
from jax.experimental.pallas import tpu as pltpu

# categorical cardinalities for client == 1
CARDS = (6, 3, 2, 2, 8, 3, 5, 3, 3, 5, 3, 3, 2)   # sum = 48
N_CONT = 6
N_CAT = len(CARDS)                                # 13
CAT_DIM = sum(CARDS)                              # 48
IN_DIM = N_CONT + CAT_DIM                         # 54
FEAT_PAD = 64                                     # padded feature width (K of layer 1)
N_HIDDEN_1 = 1024
N_HIDDEN_2 = 64
RAW_DIM = N_CONT + N_CAT                          # 19


def _round_up(n, m):
    return ((n + m - 1) // m) * m


def _choose_tm(B, tm_cap):
    """Batch tile: multiple of 8, hard-capped at 2048 (VMEM-safe), and sized so
    the grid has at least 2 steps when the batch allows it (v7x megacore)."""
    tm_cap = _round_up(max(8, min(int(tm_cap), 2048)), 8)
    B8 = _round_up(B, 8)
    two_step = max(8, _round_up((B8 + 1) // 2, 8))
    return min(tm_cap, two_step)


def _make_tables():
    """EXPAND [19,64] bf16: cols 0:6 identity (continuous passthrough),
       cols 6:54 replicate code i across its one-hot slots, cols 54:64 zero.
       VALS [1,64] f32: target value for each one-hot slot, -1 elsewhere."""
    col_of = np.repeat(np.arange(N_CAT), CARDS)                   # [48]
    val_of = np.concatenate([np.arange(c) for c in CARDS])        # [48]
    expand = np.zeros((RAW_DIM, FEAT_PAD), np.float32)
    expand[np.arange(N_CONT), np.arange(N_CONT)] = 1.0
    expand[N_CONT + col_of, N_CONT + np.arange(CAT_DIM)] = 1.0
    vals = np.full((1, FEAT_PAD), -1.0, np.float32)
    vals[0, N_CONT:N_CONT + CAT_DIM] = val_of.astype(np.float32)
    return jnp.asarray(expand, jnp.bfloat16), jnp.asarray(vals, jnp.float32)


def _mlp_kernel(x_ref, expand_ref, vals_ref, w1_ref, b1_ref, w2_ref, b2_ref,
                o_ref):
    """Fused one-hot + tanh( tanh(feat @ W1 + b1) @ W2 + b2 ) on one batch tile."""
    x = x_ref[...]                                        # [TM, 19] f32

    # One small bf16 dot lays the raw columns out in the 64-wide feature frame:
    #   cols 0:6 -> continuous values, cols 6:54 -> replicated codes, rest 0.
    # Codes are small integers (<= 7) so bf16 / the 0-1 matmul are exact.
    x_exp = jnp.dot(x.astype(jnp.bfloat16), expand_ref[...],
                    preferred_element_type=jnp.float32)   # [TM, 64] f32
    col = jax.lax.broadcasted_iota(jnp.int32, x_exp.shape, 1)
    onehot = (x_exp == vals_ref[...]).astype(jnp.float32)
    feat = jnp.where(col < N_CONT, x_exp, onehot).astype(jnp.bfloat16)  # [TM, 64]

    # Layer 1: single K=64 bf16 MXU dot, f32 accumulation.
    h1 = jnp.tanh(
        jnp.dot(feat, w1_ref[...], preferred_element_type=jnp.float32)
        + b1_ref[...])                                    # [TM, 1024] f32

    # Layer 2: bf16 LHS, f32 accumulation, direct [TM, 64] store.
    o_ref[...] = jnp.tanh(
        jnp.dot(h1.astype(jnp.bfloat16), w2_ref[...],
                preferred_element_type=jnp.float32)
        + b2_ref[...]).astype(o_ref.dtype)


def mlp_forward_pallas(x_raw, kparams, *, tm=2048):
    """x_raw: [B, 19] f32 raw input -> [B, 64] f32."""
    expand, vals, w1f, b1r, w2b, b2r = kparams
    B = x_raw.shape[0]

    TM = _choose_tm(B, tm)
    B_pad = _round_up(B, TM)
    if B_pad != B:
        x_raw = jnp.pad(x_raw, ((0, B_pad - B), (0, 0)))
    grid = (B_pad // TM,)

    out = pl.pallas_call(
        _mlp_kernel,
        out_shape=jax.ShapeDtypeStruct((B_pad, N_HIDDEN_2), jnp.float32),
        grid_spec=pltpu.PrefetchScalarGridSpec(
            num_scalar_prefetch=0,
            grid=grid,
            in_specs=[
                pl.BlockSpec((TM, RAW_DIM), lambda i: (i, 0)),            # x tile
                pl.BlockSpec((RAW_DIM, FEAT_PAD), lambda i: (0, 0)),      # EXPAND (bf16)
                pl.BlockSpec((1, FEAT_PAD), lambda i: (0, 0)),            # VALS
                pl.BlockSpec((FEAT_PAD, N_HIDDEN_1), lambda i: (0, 0)),   # W1 (bf16)
                pl.BlockSpec((1, N_HIDDEN_1), lambda i: (0, 0)),          # b1
                pl.BlockSpec((N_HIDDEN_1, N_HIDDEN_2), lambda i: (0, 0)), # W2 (bf16)
                pl.BlockSpec((1, N_HIDDEN_2), lambda i: (0, 0)),          # b2
            ],
            out_specs=pl.BlockSpec((TM, N_HIDDEN_2), lambda i: (i, 0)),
        ),
        compiler_params=pltpu.CompilerParams(
            dimension_semantics=("parallel",),
            vmem_limit_bytes=40 * 1024 * 1024,
        ),
    )(x_raw, expand, vals, w1f, b1r, w2b, b2r)

    return out if B_pad == B else out[:B]


def prepare_params(w1, b1, w2, b2):
    """Convert plain f32 params (W1 [54,1024], b1 [1024], W2 [1024,64], b2 [64])
    into the kernel layout: one [64,1024] bf16 W1 block, bf16 W2, f32 biases."""
    expand, vals = _make_tables()
    w1f = jnp.zeros((FEAT_PAD, N_HIDDEN_1), jnp.bfloat16)
    w1f = w1f.at[:IN_DIM].set(w1.astype(jnp.bfloat16))
    b1r = b1.reshape(1, N_HIDDEN_1).astype(jnp.float32)
    w2b = w2.astype(jnp.bfloat16)
    b2r = b2.reshape(1, N_HIDDEN_2).astype(jnp.float32)
    return (expand, vals, w1f, b1r, w2b, b2r)


def init_params(key):
    """nn.Linear-style U(-1/sqrt(fan_in), +1/sqrt(fan_in)) init (f32)."""
    k1, k2, k3, k4 = jax.random.split(key, 4)
    bound1 = 1.0 / (IN_DIM ** 0.5)
    bound2 = 1.0 / (N_HIDDEN_1 ** 0.5)
    w1 = jax.random.uniform(k1, (IN_DIM, N_HIDDEN_1), jnp.float32, -bound1, bound1)
    b1 = jax.random.uniform(k2, (N_HIDDEN_1,), jnp.float32, -bound1, bound1)
    w2 = jax.random.uniform(k3, (N_HIDDEN_1, N_HIDDEN_2), jnp.float32, -bound2, bound2)
    b2 = jax.random.uniform(k4, (N_HIDDEN_2,), jnp.float32, -bound2, bound2)
    return w1, b1, w2, b2


def client_leakyrelu_net_2_census_forward(x, kparams, client=1, *, tm=2048):
    assert client == 1, "only the client==1 path is implemented here"
    return mlp_forward_pallas(x, kparams, tm=tm)


if __name__ == "__main__":
    key = jax.random.PRNGKey(0)
    k_params, k_cont, k_cat = jax.random.split(key, 3)

    B = 16
    cont = jax.random.normal(k_cont, (B, N_CONT), dtype=jnp.float32)
    cat_keys = jax.random.split(k_cat, N_CAT)
    cats = [
        jax.random.randint(cat_keys[i], (B, 1), 0, CARDS[i]).astype(jnp.float32)
        for i in range(N_CAT)
    ]
    x = jnp.concatenate([cont] + cats, axis=1)            # [B, 19]

    w1, b1, w2, b2 = init_params(k_params)
    kparams = prepare_params(w1, b1, w2, b2)

    # tm=8 -> TM=8, grid=(2,): exercises the tiled / multi-step (megacore) path.
    out = client_leakyrelu_net_2_census_forward(x, kparams, client=1, tm=8)
    out = jax.block_until_ready(out)

    # Pure-JAX reference mirroring the kernel's (bf16-weight / bf16-feature) numerics.
    z = x[:, N_CONT:].astype(jnp.int32)
    pieces = [x[:, :N_CONT].astype(jnp.bfloat16).astype(jnp.float32)]
    for i, c in enumerate(CARDS):
        pieces.append(jax.nn.one_hot(z[:, i], c, dtype=jnp.float32))
    feat = jnp.concatenate(pieces, axis=1)                 # [B, 54]

    _, _, w1f, b1r, w2b, b2r = kparams
    w1_f32 = w1f[:IN_DIM].astype(jnp.float32)
    h1 = jnp.tanh(
        jnp.dot(feat, w1_f32, precision=jax.lax.Precision.HIGHEST) + b1r)
    h1b = h1.astype(jnp.bfloat16).astype(jnp.float32)
    ref = jnp.tanh(
        jnp.dot(h1b, w2b.astype(jnp.float32),
                precision=jax.lax.Precision.HIGHEST) + b2r)

    assert out.shape == (B, N_HIDDEN_2)
    max_err = float(jnp.max(jnp.abs(out - ref)))
    assert jnp.allclose(out, ref, atol=5e-3, rtol=0.0), max_err

    print("KERNEL_OK")
</pallas_src>

<mosaic_0001>
module attributes {stable_mosaic.version = 11 : i64} {
  func.func @_mlp_kernel(%arg0: i32, %arg1: memref<8x19xf32, #tpu.memory_space<vmem>>, %arg2: memref<19x64xbf16, #tpu.memory_space<vmem>>, %arg3: memref<1x64xf32, #tpu.memory_space<vmem>>, %arg4: memref<64x1024xbf16, #tpu.memory_space<vmem>>, %arg5: memref<1x1024xf32, #tpu.memory_space<vmem>>, %arg6: memref<1024x64xbf16, #tpu.memory_space<vmem>>, %arg7: memref<1x64xf32, #tpu.memory_space<vmem>>, %arg8: memref<8x64xf32, #tpu.memory_space<vmem>>) attributes {dimension_semantics = [#tpu.dimension_semantics<parallel>], iteration_bounds = array<i64: 2>, scalar_prefetch = 0 : i64, scratch_operands = 0 : i64, tpu.core_type = #tpu.core_type<tc>, window_params = [{transform_indices = @transform_0, window_bounds = array<i64: 8, 19>}, {pipeline_mode = #tpu.pipeline_mode<synchronous>, transform_indices = @transform_1, window_bounds = array<i64: 19, 64>}, {pipeline_mode = #tpu.pipeline_mode<synchronous>, transform_indices = @transform_2, window_bounds = array<i64: 1, 64>}, {pipeline_mode = #tpu.pipeline_mode<synchronous>, transform_indices = @transform_3, window_bounds = array<i64: 64, 1024>}, {pipeline_mode = #tpu.pipeline_mode<synchronous>, transform_indices = @transform_4, window_bounds = array<i64: 1, 1024>}, {pipeline_mode = #tpu.pipeline_mode<synchronous>, transform_indices = @transform_5, window_bounds = array<i64: 1024, 64>}, {pipeline_mode = #tpu.pipeline_mode<synchronous>, transform_indices = @transform_6, window_bounds = array<i64: 1, 64>}, {transform_indices = @transform_7, window_bounds = array<i64: 8, 64>}]} {
    %c0 = arith.constant 0 : index
    %c0_0 = arith.constant 0 : index
    %0 = vector.load %arg1[%c0, %c0_0] : memref<8x19xf32, #tpu.memory_space<vmem>>, vector<8x19xf32>
    %1 = arith.truncf %0 : vector<8x19xf32> to vector<8x19xbf16>
    %c0_1 = arith.constant 0 : index
    %c0_2 = arith.constant 0 : index
    %2 = vector.load %arg2[%c0_1, %c0_2] : memref<19x64xbf16, #tpu.memory_space<vmem>>, vector<19x64xbf16>
    %cst = arith.constant dense<0.000000e+00> : vector<8x64xf32>
    %3 = tpu.matmul %1, %2, %cst {dimension_numbers = #tpu.dot_dimension_numbers<[1], [0], [0], [1], [0, 0, 1, 1], [], []>} : vector<8x19xbf16>, vector<19x64xbf16>, vector<8x64xf32> -> vector<8x64xf32>
    %4 = tpu.iota {dimensions = array<i32: 1>} : vector<8x64xi32>
    %c0_3 = arith.constant 0 : index
    %c0_4 = arith.constant 0 : index
    %5 = vector.load %arg3[%c0_3, %c0_4] : memref<1x64xf32, #tpu.memory_space<vmem>>, vector<1x64xf32>
    %6 = vector.broadcast %5 : vector<1x64xf32> to vector<8x64xf32>
    %7 = arith.cmpf oeq, %3, %6 : vector<8x64xf32>
    %8 = arith.extui %7 : vector<8x64xi1> to vector<8x64xi32>
    %9 = arith.sitofp %8 : vector<8x64xi32> to vector<8x64xf32>
    %c6_i32 = arith.constant 6 : i32
    %10 = vector.broadcast %c6_i32 : i32 to vector<8x64xi32>
    %11 = arith.cmpi slt, %4, %10 : vector<8x64xi32>
    %12 = arith.select %11, %3, %9 : vector<8x64xi1>, vector<8x64xf32>
    %13 = arith.truncf %12 : vector<8x64xf32> to vector<8x64xbf16>
    %c0_5 = arith.constant 0 : index
    %c0_6 = arith.constant 0 : index
    %14 = vector.load %arg4[%c0_5, %c0_6] : memref<64x1024xbf16, #tpu.memory_space<vmem>>, vector<64x1024xbf16>
    %cst_7 = arith.constant dense<0.000000e+00> : vector<8x1024xf32>
    %15 = tpu.matmul %13, %14, %cst_7 {dimension_numbers = #tpu.dot_dimension_numbers<[1], [0], [0], [1], [0, 0, 1, 1], [], []>} : vector<8x64xbf16>, vector<64x1024xbf16>, vector<8x1024xf32> -> vector<8x1024xf32>
    %c0_8 = arith.constant 0 : index
    %c0_9 = arith.constant 0 : index
    %16 = vector.load %arg5[%c0_8, %c0_9] : memref<1x1024xf32, #tpu.memory_space<vmem>>, vector<1x1024xf32>
    %17 = vector.broadcast %16 : vector<1x1024xf32> to vector<8x1024xf32>
    %18 = arith.addf %15, %17 : vector<8x1024xf32>
    %19 = math.tanh %18 : vector<8x1024xf32>
    %20 = arith.truncf %19 : vector<8x1024xf32> to vector<8x1024xbf16>
    %c0_10 = arith.constant 0 : index
    %c0_11 = arith.constant 0 : index
    %21 = vector.load %arg6[%c0_10, %c0_11] : memref<1024x64xbf16, #tpu.memory_space<vmem>>, vector<1024x64xbf16>
    %cst_12 = arith.constant dense<0.000000e+00> : vector<8x64xf32>
    %22 = tpu.matmul %20, %21, %cst_12 {dimension_numbers = #tpu.dot_dimension_numbers<[1], [0], [0], [1], [0, 0, 1, 1], [], []>} : vector<8x1024xbf16>, vector<1024x64xbf16>, vector<8x64xf32> -> vector<8x64xf32>
    %c0_13 = arith.constant 0 : index
    %c0_14 = arith.constant 0 : index
    %23 = vector.load %arg7[%c0_13, %c0_14] : memref<1x64xf32, #tpu.memory_space<vmem>>, vector<1x64xf32>
    %24 = vector.broadcast %23 : vector<1x64xf32> to vector<8x64xf32>
    %25 = arith.addf %22, %24 : vector<8x64xf32>
    %26 = math.tanh %25 : vector<8x64xf32>
    %c0_15 = arith.constant 0 : index
    %c0_16 = arith.constant 0 : index
    %27 = vector.load %arg8[%c0_15, %c0_16] : memref<8x64xf32, #tpu.memory_space<vmem>>, vector<8x64xf32>
    tpu.vector_store %arg8[%c0_15, %c0_16], %26 {strides = array<i32>} : memref<8x64xf32, #tpu.memory_space<vmem>>, vector<8x64xf32>,
    return
  }
  func.func @transform_0(%arg0: i32) -> (i32, i32) {
    %c0_i32 = arith.constant 0 : i32
    %c0_i32_0 = arith.constant 0 : i32
    return %arg0, %c0_i32 : i32, i32
  }
  func.func @transform_1(%arg0: i32) -> (i32, i32) {
    %c0_i32 = arith.constant 0 : i32
    %c0_i32_0 = arith.constant 0 : i32
    %c0_i32_1 = arith.constant 0 : i32
    return %c0_i32, %c0_i32_0 : i32, i32
  }
  func.func @transform_2(%arg0: i32) -> (i32, i32) {
    %c0_i32 = arith.constant 0 : i32
    %c0_i32_0 = arith.constant 0 : i32
    %c0_i32_1 = arith.constant 0 : i32
    return %c0_i32, %c0_i32_0 : i32, i32
  }
  func.func @transform_3(%arg0: i32) -> (i32, i32) {
    %c0_i32 = arith.constant 0 : i32
    %c0_i32_0 = arith.constant 0 : i32
    %c0_i32_1 = arith.constant 0 : i32
    return %c0_i32, %c0_i32_0 : i32, i32
  }
  func.func @transform_4(%arg0: i32) -> (i32, i32) {
    %c0_i32 = arith.constant 0 : i32
    %c0_i32_0 = arith.constant 0 : i32
    %c0_i32_1 = arith.constant 0 : i32
    return %c0_i32, %c0_i32_0 : i32, i32
  }
  func.func @transform_5(%arg0: i32) -> (i32, i32) {
    %c0_i32 = arith.constant 0 : i32
    %c0_i32_0 = arith.constant 0 : i32
    %c0_i32_1 = arith.constant 0 : i32
    return %c0_i32, %c0_i32_0 : i32, i32
  }
  func.func @transform_6(%arg0: i32) -> (i32, i32) {
    %c0_i32 = arith.constant 0 : i32
    %c0_i32_0 = arith.constant 0 : i32
    %c0_i32_1 = arith.constant 0 : i32
    return %c0_i32, %c0_i32_0 : i32, i32
  }
  func.func @transform_7(%arg0: i32) -> (i32, i32) {
    %c0_i32 = arith.constant 0 : i32
    %c0_i32_0 = arith.constant 0 : i32
    return %arg0, %c0_i32 : i32, i32
  }
}

</mosaic_0001>

<bundles_post_ra>
// kernel: tpu_custom_call.1
= control target key start
LH: loop header
LB: loop body
LE: loop exit
PB: predicated region body
PF: predicated region fallthrough
CT: control target
= control target key end

     0   :  { %12 = vsyncpa [#allocation3], 0  ;;  %s2392_s0 = inlined_call_operand.vmem [shape: f32[16,19], index: 0, kind: input, shape index: {}]   ;;  %s2393_s1 = inlined_call_operand.vmem [shape: bf16[19,64], index: 1, kind: input, shape index: {}]   ;;  %s2394_s2 = inlined_call_operand.vmem [shape: f32[1,64], index: 2, kind: input, shape index: {}]   ;;  %s2395_s3 = inlined_call_operand.vmem [shape: bf16[64,1024], index: 3, kind: input, shape index: {}]   ;;  %s2396_s4 = inlined_call_operand.vmem [shape: f32[1,1024], index: 4, kind: input, shape index: {}]   ;;  %s2397_s5 = inlined_call_operand.vmem [shape: bf16[1024,64], index: 5, kind: input, shape index: {}]   ;;  %s2398_s6 = inlined_call_operand.vmem [shape: f32[1,64], index: 6, kind: input, shape index: {}]   ;;  %s2399_s7 = inlined_call_operand.hbm [shape: f32[16,64], index: 7, kind: output, shape index: {}]  }
   0x1   :  { %14 = vsyncpa [#allocation3 + $0x1], 0  ;;  %s1978_s24 = smov 0   ;;  %s1980_s25 = smov 0  }
   0x2   :  { %s1982_s26 = smov 0   ;;  %s1984_s27 = smov 0  }
   0x3 LB: > { %s1999_s28 = sadd.s32 4294967295, %s1931_s27   ;;  %s1527_s29 = sadd.s32 4294967294, %s1931_s27   ;;  %s1931_s27 = sphi %s1984_s27, %s2405_s27   ;;  %s1927_s26 = sphi %s1982_s26, %s2404_s26   ;;  %s1923_s25 = sphi %s1980_s25, %s2403_s25   ;;  %s1919_s24 = sphi %s1978_s24, %s2402_s24  }
   0x4   : > { %s2003_s30 = sadd.s32 1, %s1931_s27   ;;  %s179_s8 = sadd.s32 1, %s1927_s26 }
   0x5   : > { %s176_s9 = ssub.s32 %s1931_s27, %s2003_s30  ;;  %p189_p0 = scmp.ne.s32.totalorder %s1927_s26, %s1923_s25 }
   0x6   : > { %p177_p1 = scmp.eq.s32.totalorder %s176_s9, 0  ;;  %p190_p2 = scmp.eq.s32.totalorder %s1999_s28, 1 }
   0x7   : > { %p195_p3 = scmp.ne.s32.totalorder %s1923_s25, %s1919_s24  ;;  %p196_p4 = scmp.eq.s32.totalorder %s1527_s29, 1 }
   0x8   : > { %s2014_s10 = scalar_select %p177_p1, %s1927_s26, %s179_s8  }
   0x9   : > { %p2016_p5 = por %p190_p2, %p189_p0  ;;  %p2020_p6 = por %p196_p4, %p195_p3 }
   0xa   : > { %p1530_p7 = scmp.ge.s32.totalorder %s1931_s27, 1  ;;  %p239_p8 = scmp.lt.s32.totalorder %s1931_s27, 3 }
   0xc   : > { %p240_p9 = pnand %p1530_p7, %p239_p8 }
   0xd   : > { %v1785_v0 = vld [vmem:[%s2393_s1] sm:$0xff] (!%p240_p9)   ;;  %v1933_v1 = vmov (!%p240_p9), 0.0   ;;  %v1786_v2 = vld [vmem:[%s2393_s1 + $0x8] ss:$0 sps:$4 sm:$0x33] (!%p240_p9)   ;;  %vm293_vm0 = vcmask (!%p240_p9), 1040384   ;;  %v340_v50 = vlaneseq (!%p240_p9) }
   0xe   : > { %243 = sbr.rel (%p240_p9) target bundleno = 751 (0x2ef), region = 48  ;;  %1734 = vmatprep.subr.bf16.mxu0 (!%p240_p9), %v1933_v1  ;;  %vm294_vm1 = vcmask (!%p240_p9), 1041408   ;;  %p270_p10 = scmp.lt.s32.totalorder (!%p240_p9), %s1999_s28, 1  ;;  %v355_v3 = vld [vmem:[%s2395_s3] sm:$0xff] (!%p240_p9)  ;;  %v1934_v4 = vmov (!%p240_p9), 65535   ;;  %vm1935_vm2 = vmmov (!%p240_p9), 0  }
   0xf   : > { %1735 = vmatpush3.bf16.msra.mxu0 (!%p240_p9), %v1785_v0  ;;  %v295_v5 = vsel (!%p240_p9), %vm293_vm0, 4294967295, %v1934_v4  ;;  %1738 = vmatprep.mubr.msk.bf16.mxu0 (!%p240_p9), %vm1935_vm2, %v1933_v1  ;;  %v359_v6 = vld [vmem:[%s2395_s3 + $0x20] sm:$0xff] (!%p240_p9)  ;;  %v356_v7 = vld [vmem:[%s2395_s3 + $0x8] sm:$0xff] (!%p240_p9)  ;;  %vm289_vm3 = vcmask (!%p240_p9), 154624   ;;  %v357_v41 = vld [vmem:[%s2395_s3 + $0x10] sm:$0xff] (!%p240_p9)  ;;  %v1936_v48 = vmov (!%p240_p9), 0  }
  0x10   : > { %1736 = vmatprep.subr.bf16.mxu0 (!%p240_p9), %v1933_v1  ;;  %v360_v8 = vld [vmem:[%s2395_s3 + $0x28] sm:$0xff] (!%p240_p9)  ;;  %v296_v9 = vsel (!%p240_p9), %vm294_vm1, %v295_v5, 0  ;;  %v1539_v10 = vcombine.high (!%p240_p9), %v355_v3, %v359_v6  ;;  %v363_v12 = vld [vmem:[%s2395_s3 + $0x40] sm:$0xff] (!%p240_p9)  ;;  %v1538_v15 = vcombine.low (!%p240_p9), %v355_v3, %v359_v6  ;;  %v361_v42 = vld [vmem:[%s2395_s3 + $0x30] sm:$0xff] (!%p240_p9)  ;;  %625 = vmatprep.mubr.bf16.mxu1 (!%p240_p9), %v1936_v48  ;;  %v341_v51 = vand.u32 (!%p240_p9), 127, %v340_v50  ;;  %s267_s29 = sand.u32 (!%p240_p9), 1, %s1923_s25  }
  0x11   : > { %v1541_v11 = vcombine.high (!%p240_p9), %v356_v7, %v360_v8  ;;  %v367_v13 = vld [vmem:[%s2395_s3 + $0x60] sm:$0xff] (!%p240_p9)  ;;  %v298_v14 = vand.u32 (!%p240_p9), %v1786_v2, %v296_v9  ;;  %v364_v19 = vld [vmem:[%s2395_s3 + $0x48] sm:$0xff] (!%p240_p9)  ;;  %v1540_v23 = vcombine.low (!%p240_p9), %v356_v7, %v360_v8  ;;  %v358_v43 = vld [vmem:[%s2395_s3 + $0x18] sm:$0xff] (!%p240_p9)  ;;  %v1543_v44 = vcombine.high (!%p240_p9), %v357_v41, %v361_v42  ;;  %s1531_s9 = sshll.u32 (!%p240_p9), %s267_s29, 3  ;;  %s1640_s13 = sshll.u32 (!%p240_p9), %s1999_s28, 7 }
  0x12   : > { %v1547_v16 = vcombine.high (!%p240_p9), %v363_v12, %v367_v13  ;;  %v371_v17 = vld [vmem:[%s2395_s3 + $0x80] sm:$0xff] (!%p240_p9)  ;;  %593 = vmatprep.subr.bf16.mxu1 (!%p240_p9), %v1539_v10  ;;  %v368_v20 = vld [vmem:[%s2395_s3 + $0x68] sm:$0xff] (!%p240_p9)  ;;  %v1546_v21 = vcombine.low (!%p240_p9), %v363_v12, %v367_v13  ;;  %v362_v45 = vld [vmem:[%s2395_s3 + $0x38] sm:$0xff] (!%p240_p9)  ;;  %v1542_v46 = vcombine.low (!%p240_p9), %v357_v41, %v361_v42  ;;  %vm352_vm4 = vcmp.lt.s32.totalorder (!%p240_p9), %v341_v51, 6  ;;  %s2349_s17 = scalar_lea.hbm (!%p240_p9), %s2399_s7, %s1640_s13  ;;  %s1455_s18 = scalar_lea.sflag (!%p240_p9), [#allocation3], %s267_s29 }
  0x13   : > { %v375_v18 = vld [vmem:[%s2395_s3 + $0xa0] sm:$0xff] (!%p240_p9)  ;;  %1737 = vmatpush3.bf16.msra.mxu0 (!%p240_p9), %v298_v14  ;;  %594 = vmatpush1.bf16.msra.mxu1 (!%p240_p9), %v1538_v15  ;;  %v372_v25 = vld [vmem:[%s2395_s3 + $0x88] sm:$0xff] (!%p240_p9)  ;;  %v1549_v28 = vcombine.high (!%p240_p9), %v364_v19, %v368_v20  ;;  %v1548_v30 = vcombine.low (!%p240_p9), %v364_v19, %v368_v20  ;;  %v1544_v47 = vcombine.low (!%p240_p9), %v358_v43, %v362_v45  ;;  %v365_v54 = vld [vmem:[%s2395_s3 + $0x50] sm:$0xff] (!%p240_p9)  ;;  %vm589_vm6 = vcmask (!%p240_p9), 523264  }
  0x14   : > { %634 = vmatprep.subr.bf16.mxu0 (!%p240_p9), %v1541_v11  ;;  %595 = vmatprep.subr.bf16.mxu1 (!%p240_p9), %v1547_v16  ;;  %v1555_v24 = vcombine.high (!%p240_p9), %v371_v17, %v375_v18  ;;  %v376_v26 = vld [vmem:[%s2395_s3 + $0xa8] sm:$0xff] (!%p240_p9)  ;;  %v1554_v29 = vcombine.low (!%p240_p9), %v371_v17, %v375_v18  ;;  %v379_v33 = vld [vmem:[%s2395_s3 + $0xc0] sm:$0xff] (!%p240_p9)  ;;  %v1545_v49 = vcombine.high (!%p240_p9), %v358_v43, %v362_v45  ;;  %v369_v56 = vld [vmem:[%s2395_s3 + $0x70] sm:$0xff] (!%p240_p9) }
  0x15   : > { %s271_s8 = scalar_select %p270_p10, %s1999_s28, 1  ;;  %v1557_v31 = vcombine.high %v372_v25, %v376_v26  ;;  %v1556_v32 = vcombine.low %v372_v25, %v376_v26  ;;  %v383_v34 = vld [vmem:[%s2395_s3 + $0xe0] sm:$0xff]  ;;  %v380_v35 = vld [vmem:[%s2395_s3 + $0xc8] sm:$0xff]  ;;  %v366_v57 = vld [vmem:[%s2395_s3 + $0x58] sm:$0xff]  ;;  %v1551_v0 = vcombine.high %v365_v54, %v369_v56  ;;  %v1550_v6 = vcombine.low %v365_v54, %v369_v56 }
  0x16   : > { %v1563_v36 = vcombine.high %v379_v33, %v383_v34  ;;  %v384_v37 = vld [vmem:[%s2395_s3 + $0xe8] sm:$0xff]  ;;  %v1562_v40 = vcombine.low %v379_v33, %v383_v34  ;;  %v1536_v52 = vld [vmem:[%s2394_s2] ss:$0 sm:$0xff]  ;;  %v370_v58 = vld [vmem:[%s2395_s3 + $0x78] sm:$0xff]  ;;  %s1937_s28 = smov [#allocation2]  }
  0x17   : > { %s1532_s20 = sshll.u32 %s271_s8, 3  ;;  %596 = vmatpush1.bf16.msra.mxu1 %v1546_v21  ;;  %v1564_v38 = vcombine.low %v380_v35, %v384_v37  ;;  %v1565_v39 = vcombine.high %v380_v35, %v384_v37  ;;  %v1553_v2 = vcombine.high %v366_v57, %v370_v58  ;;  %v373_v3 = vld [vmem:[%s2395_s3 + $0x90] sm:$0xff]  ;;  %v374_v5 = vld [vmem:[%s2395_s3 + $0x98] sm:$0xff]  ;;  %v1552_v7 = vcombine.low %v366_v57, %v370_v58  ;;  %v1787_v20 = vld [vmem:[%s2397_s5 + $0x40] sm:$0xff]  }
  0x18   : > { %s273_s14 = scalar_lea.vmem %s2392_s0, %s1532_s20  ;;  %597 = vmatprep.subr.bf16.mxu1 %v1555_v24  ;;  %v377_v4 = vld [vmem:[%s2395_s3 + $0xb0] sm:$0xff]  ;;  %v382_v12 = vld [vmem:[%s2395_s3 + $0xd8] sm:$0xff]  ;;  %v1788_v21 = vld [vmem:[%s2397_s5 + $0xc0] sm:$0xff]   ;;  %s1873_s20 = sshll.u32 %s1937_s28, 4  ;;  %s1874_s20 = int_to_ptr.vmem [resolvable:$false] %s1873_s20 }
  0x19   : > { %v275_v22 = vld [vmem:[%s273_s14] sm:$0xff]  ;;  %v1559_v8 = vcombine.high %v373_v3, %v377_v4  ;;  %v381_v10 = vld [vmem:[%s2395_s3 + $0xd0] sm:$0xff]  ;;  %v386_v13 = vld [vmem:[%s2395_s3 + $0xf8] sm:$0xff]  ;;  %v1558_v14 = vcombine.low %v373_v3, %v377_v4  ;;  %s269_s14 = scalar_lea.vmem [#allocation2], %s1531_s9  ;;  %s1875_s21 = scalar_lea.vmem %s1874_s20, 256 }
  0x1a   : > { %v276_v27 = vpack.c.bf16 %v275_v22, %v275_v22  ;;  %v385_v11 = vld [vmem:[%s2395_s3 + $0xf0] sm:$0xff]  ;;  %v1569_v17 = vcombine.high %v382_v12, %v386_v13  ;;  %v1568_v19 = vcombine.low %v382_v12, %v386_v13  ;;  %v1789_v22 = vld [vmem:[%s2397_s5] sm:$0xff]   ;;  %v1791_v24 = vld [vmem:[%s2397_s5 + $0x48] sm:$0xff]   ;;  %s1468_s8 = sshll.u32 %s269_s14, 4  ;;  %s2351_s8 = int_to_ptr.vmem [resolvable:$true] %s1468_s8 }
  0x1b   : > { %598 = vmatpush1.bf16.msra.mxu1 %v1554_v29  ;;  %v1567_v16 = vcombine.high %v381_v10, %v385_v11  ;;  %v1566_v18 = vcombine.low %v381_v10, %v385_v11  ;;  %v1792_v25 = vld [vmem:[%s2397_s5 + $0xc8] sm:$0xff]   ;;  %v1796_v29 = vld [vmem:[%s2397_s5 + $0xd0] sm:$0xff]   ;;  %v1800_v33 = vld [vmem:[%s2397_s5 + $0xd8] sm:$0xff]   ;;  %s1869_s19 = scalar_lea.vmem %s2351_s8, 128  ;;  %p1876_p0 = scmp.lt.s32.totalorder %s2351_s8, %s1874_s20 }
  0x1c   : > { %1739 = vmatmul.mubr.msk.bf16.vlgmr.msra.gmra.mrb[0].mxu0 %vm289_vm3, %v276_v27  ;;  %599 = vmatprep.subr.bf16.mxu1 %v1563_v36  ;;  %v1793_v26 = vld [vmem:[%s2397_s5 + $0x8] sm:$0xff]   ;;  %v1801_v34 = vld [vmem:[%s2397_s5 + $0x18] sm:$0xff]   ;;  %v1803_v36 = vld [vmem:[%s2397_s5 + $0x60] sm:$0xff]   ;;  %p1870_p11 = scmp.ne.s32.totalorder %s2351_s8, %s1869_s19  ;;  %p1877_p1 = scmp.lt.s32.totalorder %s1875_s21, %s1869_s19 }
  0x1d   : > { %635 = vmatpush1.bf16.msra.mxu0 %v1540_v23  ;;  %666 = vmatprep.mubr.bf16.mxu0 %v1936_v48  ;;  %v1790_v23 = vld [vmem:[%s2397_s5 + $0x80] sm:$0xff]   ;;  %v1794_v27 = vld [vmem:[%s2397_s5 + $0x88] sm:$0xff]   ;;  %v1802_v35 = vld [vmem:[%s2397_s5 + $0x98] sm:$0xff]  }
  0x1e   : > { %636 = vmatprep.subr.bf16.mxu0 %v1549_v28  ;;  %v1795_v28 = vld [vmem:[%s2397_s5 + $0x50] sm:$0xff]   ;;  %v1804_v37 = vld [vmem:[%s2397_s5 + $0xe0] sm:$0xff]   ;;  %v1808_v41 = vld [vmem:[%s2397_s5 + $0xe8] sm:$0xff]   ;;  %p1871_p12 = pnand %p1870_p11, %p2016_p5  ;;  %p1878_p2 = por %p1877_p1, %p1876_p0 }
  0x1f   : > { %600 = vmatpush1.bf16.msra.mxu1 %v1562_v40  ;;  %v1807_v40 = vld [vmem:[%s2397_s5 + $0x68] sm:$0xff]   ;;  %v1812_v45 = vld [vmem:[%s2397_s5 + $0xf0] sm:$0xff]   ;;  %v1817_v51 = vld [vmem:[%s2397_s5 + $0x38] sm:$0xff]  }
  0x20   : > { %675 = vmatprep.subr.bf16.mxu1 %v1543_v44  ;;  %v1809_v42 = vld [vmem:[%s2397_s5 + $0x28] sm:$0xff]   ;;  %v1811_v44 = vld [vmem:[%s2397_s5 + $0x70] sm:$0xff]   ;;  %v1820_v54 = vld [vmem:[%s2397_s5 + $0x1c0] sm:$0xff]   ;;  %p1872_p13 = pneg %p1871_p12 }
  0x21   : > { %637 = vmatpush1.bf16.msra.mxu0 %v1548_v30  ;;  %v1797_v30 = vld [vmem:[%s2397_s5 + $0x10] sm:$0xff]   ;;  %v1810_v43 = vld [vmem:[%s2397_s5 + $0xa8] sm:$0xff]   ;;  %v387_v58 = vld [vmem:[%s2396_s4] sm:$0xff] }
  0x22   : > { %638 = vmatprep.subr.bf16.mxu0 %v1557_v31  ;;  %v1798_v31 = vld [vmem:[%s2397_s5 + $0x90] sm:$0xff]   ;;  %p1879_p3 = pnand %p1878_p2, %p1872_p13 }
  0x25   : > { %639 = vmatpush1.bf16.msra.mxu0 %v1556_v32  ;;  %v1799_v32 = vld [vmem:[%s2397_s5 + $0x58] sm:$0xff]  }
  0x26   : > { %640 = vmatprep.subr.bf16.mxu0 %v1565_v39  ;;  %v1806_v39 = vld [vmem:[%s2397_s5 + $0xa0] sm:$0xff]  }
  0x29   : > { %641 = vmatpush1.bf16.msra.mxu0 %v1564_v38  ;;  %v1805_v38 = vld [vmem:[%s2397_s5 + $0x20] sm:$0xff]  }
  0x2a   : > { %716 = vmatprep.subr.bf16.mxu0 %v1545_v49  ;;  %v1816_v49 = vld [vmem:[%s2397_s5 + $0xf8] sm:$0xff]  }
  0xef   : > { %v334_v53 = vpop.f32.mrb[0].mxu0 }
  0xf0   : > { %vm349_vm5 = vcmp.eq.f32.partialorder %v334_v53, %v1536_v52  ;;  %v1740_v55 = vpop.f32.mrb[1].mxu0  ;;  %v1818_v52 = vld [vmem:[%s2397_s5 + $0xb8] sm:$0xff]  }
  0xf1   : > { %v1537_v59 = vsel %vm349_vm5, 1.0, %v1933_v1  ;;  %v337_v60 = vpop.f32.mrb[2].mxu0  ;;  %v378_v1 = vld [vmem:[%s2395_s3 + $0xb8] sm:$0xff]  ;;  %v390_v55 = vshrl.u32 %v340_v50, 7 }
  0xf2   : > { %v353_v61 = vsel %vm352_vm4, %v334_v53, %v1537_v59  ;;  %v1741_v62 = vpop.f32.mrb[3].mxu0  ;;  %v1561_v9 = vcombine.high %v374_v5, %v378_v1  ;;  %v1560_v15 = vcombine.low %v374_v5, %v378_v1  ;;  %v1819_v53 = vld [vmem:[%s2397_s5 + $0x140] sm:$0xff]  }
  0xf3   : > { %v354_v63 = vpack.c.bf16 %v353_v61, %v353_v61  ;;  %v391_v56 = vsub.s32 0, %v390_v55  ;;  %v399_v57 = vsub.s32 2, %v390_v55  ;;  %v395_v59 = vsub.s32 1, %v390_v55 }
  0xf4   : > { %v403_v60 = vsub.s32 3, %v390_v55  ;;  %v407_v12 = vsub.s32 4, %v390_v55  ;;  %v415_v13 = vsub.s32 6, %v390_v55 }
  0xf5   : > { %1570 = vmatmul.mubr.msk.bf16.vlgmr.msra.gmra.mrb[0].mxu1 %vm589_vm6, %v354_v63  ;;  %1571 = vmatmul.mubr.msk.bf16.vlgmr.msra.gmra.mrb[4].mxu0 %vm589_vm6, %v354_v63  ;;  %v392_v61 = vrot.slane %v387_v58, %v391_v56  ;;  %v400_v62 = vrot.slane %v387_v58, %v399_v57  ;;  %v1836_v56 = vld [vmem:[%s2397_s5 + $0x1e0] sm:$0xff]  }
  0xf6   : > { %676 = vmatpush1.bf16.msra.mxu1 %v1542_v46  ;;  %717 = vmatpush1.bf16.msra.mxu0 %v1544_v47  ;;  %v1813_v46 = vld [vmem:[%s2397_s5 + $0x30] sm:$0xff]  }
  0xf7   : > { %677 = vmatprep.subr.bf16.mxu1 %v1551_v0  ;;  %718 = vmatprep.subr.bf16.mxu0 %v1553_v2  ;;  %v1814_v47 = vld [vmem:[%s2397_s5 + $0xb0] sm:$0xff]   ;;  %v404_v0 = vrot.slane %v387_v58, %v403_v60  ;;  %v1837_v60 = vld [vmem:[%s2397_s5 + $0x120] sm:$0xff]  }
  0xf8   : > { %707 = vmatprep.mubr.bf16.mxu1 %v1936_v48  ;;  %748 = vmatprep.mubr.bf16.mxu0 %v1936_v48  ;;  %v1815_v48 = vld [vmem:[%s2397_s5 + $0x78] sm:$0xff]  }
  0xfa   : > { %678 = vmatpush1.bf16.msra.mxu1 %v1550_v6  ;;  %719 = vmatpush1.bf16.msra.mxu0 %v1552_v7 }
  0xfb   : > { %679 = vmatprep.subr.bf16.mxu1 %v1559_v8  ;;  %720 = vmatprep.subr.bf16.mxu0 %v1561_v9 }
  0xfe   : > { %680 = vmatpush1.bf16.msra.mxu1 %v1558_v14  ;;  %721 = vmatpush1.bf16.msra.mxu0 %v1560_v15  ;;  %v411_v14 = vsub.s32 5, %v390_v55  ;;  %v419_v15 = vsub.s32 7, %v390_v55  ;;  %v1835_v55 = vld [vmem:[%s2397_s5 + $0x160] sm:$0xff]  }
  0xff   : > { %681 = vmatprep.subr.bf16.mxu1 %v1567_v16  ;;  %722 = vmatprep.subr.bf16.mxu0 %v1569_v17  ;;  %v408_v17 = vrot.slane %v387_v58, %v407_v12 }
 0x102   : > { %682 = vmatpush1.bf16.msra.mxu1 %v1566_v18  ;;  %723 = vmatpush1.bf16.msra.mxu0 %v1568_v19  ;;  %v416_v18 = vrot.slane %v387_v58, %v415_v13 }
 0x103   : > { %1646 = vmatprep.subr.bf16.mxu1 %v1787_v20  ;;  %1668 = vmatprep.subr.bf16.mxu0 %v1788_v21  ;;  %v412_v20 = vrot.slane %v387_v58, %v411_v14  ;;  %v420_v21 = vrot.slane %v387_v58, %v419_v15 }
 0x105   : > { %1572 = vmatmul.mubr.msk.bf16.vlgmr.msra.gmra.mrb[4].mxu1 %vm589_vm6, %v354_v63  ;;  %1573 = vmatmul.mubr.msk.bf16.vlgmr.msra.gmra.mrb[8].mxu0 %vm589_vm6, %v354_v63  ;;  %v396_v63 = vrot.slane %v387_v58, %v395_v59 }
 0x106   : > { %1647 = vmatpush3.bf16.msra.mxu1 %v1789_v22  ;;  %1669 = vmatpush3.bf16.msra.mxu0 %v1790_v23 }
 0x107   : > { %1648 = vmatprep.subr.bf16.mxu1 %v1791_v24  ;;  %1670 = vmatprep.subr.bf16.mxu0 %v1792_v25 }
 0x10a   : > { %1649 = vmatpush3.bf16.msra.mxu1 %v1793_v26  ;;  %1671 = vmatpush3.bf16.msra.mxu0 %v1794_v27  ;;  %v1821_v27 = vld [vmem:[%s2397_s5 + $0x100] sm:$0xff]  }
 0x10b   : > { %1650 = vmatprep.subr.bf16.mxu1 %v1795_v28  ;;  %1672 = vmatprep.subr.bf16.mxu0 %v1796_v29 }
 0x10e   : > { %1651 = vmatpush3.bf16.msra.mxu1 %v1797_v30  ;;  %1673 = vmatpush3.bf16.msra.mxu0 %v1798_v31 }
 0x10f   : > { %1652 = vmatprep.subr.bf16.mxu1 %v1799_v32  ;;  %1674 = vmatprep.subr.bf16.mxu0 %v1800_v33 }
 0x112   : > { %1653 = vmatpush3.bf16.msra.mxu1 %v1801_v34  ;;  %1675 = vmatpush3.bf16.msra.mxu0 %v1802_v35  ;;  %v1822_v34 = vld [vmem:[%s2397_s5 + $0x180] sm:$0xff]   ;;  %v1823_v35 = vld [vmem:[%s2397_s5 + $0x148] sm:$0xff]  }
 0x113   : > { %1654 = vmatprep.subr.bf16.mxu1 %v1803_v36  ;;  %1676 = vmatprep.subr.bf16.mxu0 %v1804_v37 }
 0x116   : > { %1655 = vmatpush3.bf16.msra.mxu1 %v1805_v38  ;;  %1677 = vmatpush3.bf16.msra.mxu0 %v1806_v39 }
 0x117   : > { %1656 = vmatprep.subr.bf16.mxu1 %v1807_v40  ;;  %1678 = vmatprep.subr.bf16.mxu0 %v1808_v41  ;;  %v1824_v41 = vld [vmem:[%s2397_s5 + $0x1c8] sm:$0xff]  }
 0x11a   : > { %1657 = vmatpush3.bf16.msra.mxu1 %v1809_v42  ;;  %1679 = vmatpush3.bf16.msra.mxu0 %v1810_v43 }
 0x11b   : > { %1658 = vmatprep.subr.bf16.mxu1 %v1811_v44  ;;  %1680 = vmatprep.subr.bf16.mxu0 %v1812_v45  ;;  %v1825_v44 = vld [vmem:[%s2397_s5 + $0x108] sm:$0xff]  }
 0x11c   : > { %v1826_v45 = vld [vmem:[%s2397_s5 + $0x188] sm:$0xff]  }
 0x11e   : > { %1659 = vmatpush3.bf16.msra.mxu1 %v1813_v46  ;;  %1681 = vmatpush3.bf16.msra.mxu0 %v1814_v47  ;;  %v1827_v46 = vld [vmem:[%s2397_s5 + $0x150] sm:$0xff]  }
 0x11f   : > { %1660 = vmatprep.subr.bf16.mxu1 %v1815_v48  ;;  %1682 = vmatprep.subr.bf16.mxu0 %v1816_v49  ;;  %v1828_v47 = vld [vmem:[%s2397_s5 + $0x1d0] sm:$0xff]  }
 0x120   : > { %v1829_v48 = vld [vmem:[%s2397_s5 + $0x110] sm:$0xff]  }
 0x121   : > { %v1830_v49 = vld [vmem:[%s2397_s5 + $0x190] sm:$0xff]  }
 0x122   : > { %1661 = vmatpush3.bf16.msra.mxu1 %v1817_v51  ;;  %1683 = vmatpush3.bf16.msra.mxu0 %v1818_v52  ;;  %v1831_v51 = vld [vmem:[%s2397_s5 + $0x158] sm:$0xff]  }
 0x123   : > { %1690 = vmatprep.subr.bf16.mxu1 %v1819_v53  ;;  %1712 = vmatprep.subr.bf16.mxu0 %v1820_v54  ;;  %v1832_v52 = vld [vmem:[%s2397_s5 + $0x1d8] sm:$0xff]  }
 0x124   : > { %v1833_v53 = vld [vmem:[%s2397_s5 + $0x118] sm:$0xff]  }
 0x125   : > { %v1834_v54 = vld [vmem:[%s2397_s5 + $0x198] sm:$0xff]  }
 0x1c8   : > { %v627_v2 = vpop.f32.mrb[0].mxu1  ;;  %v668_v3 = vpop.f32.mrb[4].mxu0 }
 0x1c9   : > { %v628_v4 = vadd.f32 %v627_v2, %v392_v61  ;;  %v669_v5 = vadd.f32 %v668_v3, %v400_v62  ;;  %v629_v1 = vpop.f32.mrb[1].mxu1  ;;  %v670_v6 = vpop.f32.mrb[5].mxu0  ;;  %v1838_v62 = vld [vmem:[%s2397_s5 + $0x1a0] sm:$0xff]   ;;  %v1841_v2 = vld [vmem:[%s2397_s5 + $0x128] sm:$0xff]  }
 0x1ca   : > { %v630_v7 = vadd.f32 %v629_v1, %v396_v63  ;;  %v671_v50 = vadd.f32 %v670_v6, %v404_v0  ;;  %v631_v8 = vpop.f32.mrb[2].mxu1  ;;  %v672_v9 = vpop.f32.mrb[6].mxu0  ;;  %v1839_v63 = vld [vmem:[%s2397_s5 + $0x168] sm:$0xff]   ;;  %v1845_v1 = vld [vmem:[%s2397_s5 + $0x130] sm:$0xff]  }
 0x1cb   : > { %1851 = vtanh.f32 %v628_v4  ;;  %v632_v10 = vpop.f32.mrb[3].mxu1  ;;  %v673_v11 = vpop.f32.mrb[7].mxu0  ;;  %v1840_v0 = vld [vmem:[%s2397_s5 + $0x1e8] sm:$0xff]   ;;  %v1843_v4 = vld [vmem:[%s2397_s5 + $0x170] sm:$0xff]   ;;  %v1849_v8 = vld [vmem:[%s2397_s5 + $0x138] sm:$0xff]  }
 0x1cc   : > { %1853 = vtanh.f32 %v669_v5  ;;  %v1842_v3 = vld [vmem:[%s2397_s5 + $0x1a8] sm:$0xff]   ;;  %v1844_v5 = vld [vmem:[%s2397_s5 + $0x1f0] sm:$0xff]   ;;  %v1850_v9 = vld [vmem:[%s2397_s5 + $0x1b8] sm:$0xff]  }
 0x1cd   : > { %1855 = vtanh.f32 %v630_v7  ;;  %v1846_v6 = vld [vmem:[%s2397_s5 + $0x1b0] sm:$0xff]   ;;  %v1847_v7 = vld [vmem:[%s2397_s5 + $0x178] sm:$0xff]  }
 0x1ce   : > { %1857 = vtanh.f32 %v671_v50  ;;  %v1848_v50 = vld [vmem:[%s2397_s5 + $0x1f8] sm:$0xff]  }
 0x1d5   : > { %v1852_v16 = vpop.eup %1851 }
 0x1d6   : > { %v1854_v19 = vpop.eup %1853  ;;  %v765_v28 = vpack.c.bf16 %v1852_v16, %v1852_v16  ;;  %v1574_v16 = vld [vmem:[%s2398_s6] ss:$0 sm:$0xff] }
 0x1d7   : > { %v1856_v22 = vpop.eup %1855  ;;  %v767_v36 = vpack.c.bf16 %v1854_v19, %v1854_v19 }
 0x1d8   : > { %v1858_v23 = vpop.eup %1857  ;;  %v766_v24 = vpack.c.bf16 %v1856_v22, %v1856_v22  ;;  %v709_v25 = vpop.f32.mrb[4].mxu1 }
 0x1d9   : > { %v750_v26 = vpop.f32.mrb[8].mxu0  ;;  %v768_v29 = vpack.c.bf16 %v1858_v23, %v1858_v23  ;;  %v710_v30 = vadd.f32 %v709_v25, %v408_v17  ;;  %v711_v32 = vpop.f32.mrb[5].mxu1 }
 0x1da   : > { %v751_v31 = vadd.f32 %v750_v26, %v416_v18  ;;  %v752_v33 = vpop.f32.mrb[9].mxu0  ;;  %v712_v37 = vadd.f32 %v711_v32, %v412_v20  ;;  %v713_v39 = vpop.f32.mrb[6].mxu1  ;;  %1324 = vmatprep.mubr.bf16.mxu1 %v766_v24 }
 0x1db   : > { %v753_v38 = vadd.f32 %v752_v33, %v420_v21  ;;  %v754_v40 = vpop.f32.mrb[10].mxu0  ;;  %1364 = vmatprep.mubr.bf16.mxu0 %v768_v29  ;;  %v714_v42 = vpop.f32.mrb[7].mxu1  ;;  %1325 = vmatmul.mubr.bf16.vlgmr.msra.gmra.mrb[8].mxu1 %v765_v28 }
 0x1dc   : > { %v755_v43 = vpop.f32.mrb[11].mxu0  ;;  %1365 = vmatmul.mubr.bf16.vlgmr.msra.gmra.mrb[12].mxu0 %v767_v36  ;;  %1691 = vmatpush3.bf16.msra.mxu1 %v1821_v27  ;;  %1859 = vtanh.f32 %v712_v37 }
 0x1dd   : > { %1713 = vmatpush3.bf16.msra.mxu0 %v1822_v34  ;;  %1692 = vmatprep.subr.bf16.mxu1 %v1823_v35  ;;  %1861 = vtanh.f32 %v753_v38 }
 0x1de   : > { %1714 = vmatprep.subr.bf16.mxu0 %v1824_v41  ;;  %1863 = vtanh.f32 %v710_v30 }
 0x1df   : > { %1865 = vtanh.f32 %v751_v31 }
 0x1e0   : > { %1693 = vmatpush3.bf16.msra.mxu1 %v1825_v44 }
 0x1e1   : > { %1715 = vmatpush3.bf16.msra.mxu0 %v1826_v45  ;;  %1694 = vmatprep.subr.bf16.mxu1 %v1827_v46 }
 0x1e2   : > { %1716 = vmatprep.subr.bf16.mxu0 %v1828_v47 }
 0x1e4   : > { %1695 = vmatpush3.bf16.msra.mxu1 %v1829_v48 }
 0x1e5   : > { %1717 = vmatpush3.bf16.msra.mxu0 %v1830_v49  ;;  %1696 = vmatprep.subr.bf16.mxu1 %v1831_v51 }
 0x1e6   : > { %1718 = vmatprep.subr.bf16.mxu0 %v1832_v52  ;;  %v1860_v57 = vpop.eup %1859 }
 0x1e7   : > { %v1862_v58 = vpop.eup %1861  ;;  %v770_v59 = vpack.c.bf16 %v1860_v57, %v1860_v57 }
 0x1e8   : > { %1697 = vmatpush3.bf16.msra.mxu1 %v1833_v53  ;;  %v772_v61 = vpack.c.bf16 %v1862_v58, %v1862_v58  ;;  %v1864_v10 = vpop.eup %1863 }
 0x1e9   : > { %1719 = vmatpush3.bf16.msra.mxu0 %v1834_v54  ;;  %1698 = vmatprep.subr.bf16.mxu1 %v1835_v55  ;;  %v1866_v11 = vpop.eup %1865  ;;  %v769_v12 = vpack.c.bf16 %v1864_v10, %v1864_v10 }
 0x1ea   : > { %1404 = vmatprep.mubr.bf16.mxu1 %v770_v59  ;;  %1720 = vmatprep.subr.bf16.mxu0 %v1836_v56  ;;  %v771_v13 = vpack.c.bf16 %v1866_v11, %v1866_v11 }
 0x1eb   : > { %1444 = vmatprep.mubr.bf16.mxu0 %v772_v61 }
 0x1ec   : > { %1699 = vmatpush3.bf16.msra.mxu1 %v1837_v60 }
 0x1ed   : > { %1721 = vmatpush3.bf16.msra.mxu0 %v1838_v62  ;;  %1700 = vmatprep.subr.bf16.mxu1 %v1839_v63 }
 0x1ee   : > { %1722 = vmatprep.subr.bf16.mxu0 %v1840_v0 }
 0x1f0   : > { %1701 = vmatpush3.bf16.msra.mxu1 %v1841_v2 }
 0x1f1   : > { %1723 = vmatpush3.bf16.msra.mxu0 %v1842_v3  ;;  %1702 = vmatprep.subr.bf16.mxu1 %v1843_v4 }
 0x1f2   : > { %1724 = vmatprep.subr.bf16.mxu0 %v1844_v5 }
 0x1f4   : > { %1703 = vmatpush3.bf16.msra.mxu1 %v1845_v1 }
 0x1f5   : > { %1725 = vmatpush3.bf16.msra.mxu0 %v1846_v6  ;;  %1704 = vmatprep.subr.bf16.mxu1 %v1847_v7 }
 0x1f6   : > { %1726 = vmatprep.subr.bf16.mxu0 %v1848_v50 }
 0x1f8   : > { %1705 = vmatpush3.bf16.msra.mxu1 %v1849_v8 }
 0x1f9   : > { %1727 = vmatpush3.bf16.msra.mxu0 %v1850_v9 }
 0x1fb   : > { %1405 = vmatmul.mubr.bf16.vlgmr.msra.gmra.mrb[12].mxu1 %v769_v12 }
 0x1fc   : > { %1445 = vmatmul.mubr.bf16.vlgmr.msra.gmra.mrb[16].mxu0 %v771_v13 }
 0x2ae   : > { %v1662_v14 = vpop.f32.mrb[8].mxu1 }
 0x2af   : > { %v1684_v15 = vpop.f32.mrb[12].mxu0  ;;  %v1663_v17 = vpop.f32.mrb[9].mxu1 }
 0x2b0   : > { %v1664_v18 = vadd.f32 %v1663_v17, %v1662_v14  ;;  %v1685_v19 = vpop.f32.mrb[13].mxu0  ;;  %v1665_v20 = vpop.f32.mrb[10].mxu1 }
 0x2b1   : > { %v1686_v21 = vadd.f32 %v1685_v19, %v1684_v15  ;;  %v1687_v22 = vpop.f32.mrb[14].mxu0  ;;  %v1666_v23 = vpop.f32.mrb[11].mxu1 }
 0x2b2   : > { %v1327_v24 = vadd.f32 %v1664_v18, %v1574_v16  ;;  %v1688_v25 = vpop.f32.mrb[15].mxu0 }
 0x2b4   : > { %v1367_v26 = vadd.f32 %v1686_v21, %v1327_v24 }
 0x2ce   : > { %v1706_v27 = vpop.f32.mrb[12].mxu1 }
 0x2cf   : > { %v1728_v28 = vpop.f32.mrb[16].mxu0  ;;  %v1707_v29 = vpop.f32.mrb[13].mxu1 }
 0x2d0   : > { %v1708_v30 = vadd.f32 %v1707_v29, %v1706_v27  ;;  %v1729_v31 = vpop.f32.mrb[17].mxu0  ;;  %v1709_v32 = vpop.f32.mrb[14].mxu1 }
 0x2d1   : > { %v1730_v33 = vadd.f32 %v1729_v31, %v1728_v28  ;;  %v1731_v34 = vpop.f32.mrb[18].mxu0  ;;  %v1710_v35 = vpop.f32.mrb[15].mxu1 }
 0x2d2   : > { %v1407_v36 = vadd.f32 %v1708_v30, %v1367_v26  ;;  %v1732_v37 = vpop.f32.mrb[19].mxu0 }
 0x2d4   : > { %v1447_v38 = vadd.f32 %v1730_v33, %v1407_v36 }
 0x2d6   : > { %1867 = vtanh.f32 %v1447_v38 }
 0x2e0   : > { %v1868_v39 = vpop.eup %1867 }
 0x2e1   : > { %1453 = vst.msk [vmem:[%s269_s14] sm:$0xff] %vm589_vm6, %v1868_v39 }
 0x2e2   : > { %1882 = shalt.err (!%p1879_p3)
}
 0x2e3   : > { %s1883_s22 = scalar_lea.hbm %s2349_s17, 128  ;;  %s1887_s9 = scalar_lea.hbm %s2399_s7, 256 }
 0x2e4   : > { %p1884_p4 = scmp.ne.s32.totalorder %s2349_s17, %s1883_s22  ;;  %p1888_p9 = scmp.lt.u32.totalorder %s2349_s17, %s2399_s7 }
 0x2e5   : > { %p1889_p10 = scmp.lt.u32.totalorder %s1887_s9, %s1883_s22  ;;  %p1891_p12 = scmp.lt.u32.totalorder %s1883_s22, %s2349_s17 }
 0x2e6   : > { %p1885_p7 = pnand %p1884_p4, %p2016_p5 }
 0x2e7   : > { %p1890_p11 = por %p1889_p10, %p1888_p9 }
 0x2e8   : > { %p1886_p8 = pneg %p1885_p7 }
 0x2e9   : > { %p1892_p13 = por %p1891_p12, %p1890_p11 }
 0x2eb   : > { %p1893_p0 = pnand %p1892_p13, %p1886_p8 }
 0x2ed   : > { %1896 = shalt.err (!%p1893_p0)
}
 0x2ee   : > { %1742 = dma.vmem_to_hbm [thread:$0]  (%p2016_p5), %s2351_s8, 128, %s2349_s17, %s1455_s18  }
 0x2ef PF: > { %p1748_p1 = scmp.ge.s32.totalorder %s1931_s27, 2  ;;  %s1480_s15 = sand.u32 1, %s1919_s24  }
 0x2f0   : > { %s1481_s16 = scalar_lea.sflag [#allocation3], %s1480_s15 }
 0x2f1   : > { %p1745_p2 = pnand %p1748_p1, %p2020_p6 }
 0x2f3   : > { %1914 = dma.done.wait (!%p1745_p2), %s1481_s16, 128  }
 0x2f4   : > { %1916 = vsyncadd (!%p1745_p2), %s1481_s16, 4294967168  ;;  %p17_p3 = scmp.ge.s32.totalorder %s2003_s30, 4   ;;  %s2402_s24 = smov %s1923_s25 }
 0x2f5   : > { %s2403_s25 = smov %s1927_s26  ;;  %s2404_s26 = smov %s2014_s10 }
 0x2f6   : > { %s2405_s27 = smov %s2003_s30  ;;  %19 = sbr.rel (!%p17_p3) target bundleno = 3 (0x3), region = 83 }
 0x2fd   :  { %1486 = vsyncpa [#allocation3], 1 }
 0x2fe   :  { %1488 = vsyncpa [#allocation3 + $0x1], 1 }

</bundles_post_ra>
